<compile_context>
chip_gen: v6e
topology: v6e:2x2x1
jax: 0.10.0
libtpu: 0.0.40
codegen_flags: <defaults>
</compile_context>

<pallas_src>
import functools

import jax
import jax.numpy as jnp
from jax.experimental import pallas as pl
from jax.experimental.pallas import tpu as pltpu


def _hard_gelu(x):
    # x < -1.5 -> 0 ; x > 1.5 -> x ; else x/3*(x+1.5)
    return jnp.where(x < -1.5,
                     jnp.zeros_like(x),
                     jnp.where(x > 1.5, x, x / 3.0 * (x + 1.5)))


def _mlp_kernel(*refs, num_layers):
    # refs = (x_ref, w0, b0, w1, b1, ..., w_{L-1}, b_{L-1}, o_ref)
    # x_ref : (C_in, T)        tokens on the lane axis
    # w_i   : (C_out_i, C_in_i) resident in VMEM (possibly bf16 for the MXU)
    # b_i   : (C_out_i, 1)      f32
    x_ref = refs[0]
    o_ref = refs[-1]
    params = refs[1:-1]

    h = x_ref[...]                                   # (C_in, T)
    for i in range(num_layers):
        w = params[2 * i][...]                       # (C_out_i, C_in_i)
        b = params[2 * i + 1][...]                   # (C_out_i, 1)
        # MXU matmul: operands in w.dtype (f32 or bf16), accumulate in f32.
        h = jnp.dot(w, h.astype(w.dtype), preferred_element_type=jnp.float32)
        h = h + b.astype(jnp.float32)
        if i < num_layers - 1:                       # HardGELU between layers
            h = _hard_gelu(h)
    o_ref[...] = h.astype(o_ref.dtype)


def mlp_pallas(x_nchw, weights, biases, *, mxu_dtype=None, max_tile_tokens=1024):
    """x_nchw: (N, C_in, H, W). weights[i]: (C_out_i, C_in_i, 1, 1). biases[i]: (C_out_i,).

    mxu_dtype: dtype fed to the MXU (default: input dtype). Use jnp.bfloat16 on
    v6e/v7x for ~2x MXU throughput + halved weight bytes (f32 accumulation kept).
    """
    num_layers = len(weights)
    N, C_in, H, W = x_nchw.shape
    hw = H * W
    C_out = int(weights[-1].shape[0])
    c_dims = [C_in] + [int(w.shape[0]) for w in weights]

    if mxu_dtype is None:
        mxu_dtype = x_nchw.dtype

    # NCHW viewed as (N, C, H*W): free reshape, no NCHW<->NHWC round trips.
    x3d = x_nchw.reshape(N, C_in, hw)

    # (C_out, C_in, 1, 1) -> (C_out, C_in) ; bias -> (C_out, 1) in f32.
    w_mats = [w[:, :, 0, 0].astype(mxu_dtype) for w in weights]
    b_mats = [b.reshape(-1, 1).astype(jnp.float32) for b in biases]

    itemsize_in = jnp.dtype(x_nchw.dtype).itemsize
    itemsize_out = itemsize_in
    param_bytes = sum(int(w.size) * jnp.dtype(w.dtype).itemsize for w in w_mats)
    param_bytes += sum(int(b.size) * 4 for b in b_mats)

    # Chip-aware VMEM budget (v7x: 64 MiB/TC, v5e/v6e: 128 MiB).
    try:
        vmem_cap = int(pltpu.get_tpu_info().vmem_capacity_bytes)
    except Exception:  # pragma: no cover - conservative fallback
        vmem_cap = 64 * 1024 * 1024

    c_max = max(c_dims)

    def _step_bytes(t):
        # double-buffered in/out token tiles + live f32 intermediates.
        return (2 * t * C_in * itemsize_in
                + 2 * t * C_out * itemsize_out
                + 3 * t * c_max * 4)

    # Largest lane-aligned token tile that divides H*W and fits the budget.
    tile_budget = max(2 << 20, vmem_cap // 2 - param_bytes)
    if hw % 128 == 0:
        tile_t = 128
        cand = 128
        while cand <= min(hw, max_tile_tokens):
            if hw % cand == 0 and _step_bytes(cand) <= tile_budget:
                tile_t = cand
            cand += 128
    else:
        # Fall back to a full-extent (per-image) tile; block == full dim is legal.
        tile_t = hw

    vmem_limit = int(min(
        max(32 << 20, param_bytes + 2 * _step_bytes(tile_t) + (4 << 20)),
        max(32 << 20, vmem_cap - (16 << 20)),
    ))

    grid = (N, hw // tile_t)

    in_specs = [pl.BlockSpec((None, C_in, tile_t), lambda ni, ti: (ni, 0, ti))]
    flat_params = []
    for wm, bm in zip(w_mats, b_mats):
        # Grid-invariant params: whole array resident in VMEM for the entire
        # call -- single-buffered, no per-step DMA.
        in_specs.append(pl.BlockSpec(memory_space=pltpu.MemorySpace.VMEM))
        in_specs.append(pl.BlockSpec(memory_space=pltpu.MemorySpace.VMEM))
        flat_params.extend([wm, bm])

    out_spec = pl.BlockSpec((None, C_out, tile_t), lambda ni, ti: (ni, 0, ti))

    tokens = N * hw
    cost = pl.CostEstimate(
        flops=2 * tokens * sum(c_dims[i] * c_dims[i + 1] for i in range(num_layers)),
        transcendentals=0,
        bytes_accessed=tokens * (C_in * itemsize_in + C_out * itemsize_out) + param_bytes,
    )

    kernel = functools.partial(_mlp_kernel, num_layers=num_layers)

    out3d = pl.pallas_call(
        kernel,
        out_shape=jax.ShapeDtypeStruct((N, C_out, hw), x_nchw.dtype),
        grid_spec=pltpu.PrefetchScalarGridSpec(
            num_scalar_prefetch=0,
            grid=grid,
            in_specs=in_specs,
            out_specs=out_spec,
        ),
        compiler_params=pltpu.CompilerParams(
            dimension_semantics=("parallel", "parallel"),
            vmem_limit_bytes=vmem_limit,
        ),
        cost_estimate=cost,
    )(x3d, *flat_params)

    # (N, C_out, H*W) -> (N, C_out, H, W): free reshape, no transpose.
    return out3d.reshape(N, C_out, H, W)


def init_mlp_params(key, in_channels, hidden_channels, num_layers, out_channels):
    """kaiming_normal_(mode='fan_out', nonlinearity='relu') init, zero bias."""
    dims = [in_channels] + [hidden_channels] * (num_layers - 1) + [out_channels]
    weights, biases = [], []
    for i in range(num_layers):
        c_in, c_out = dims[i], dims[i + 1]
        key, sub = jax.random.split(key)
        std = (2.0 / c_out) ** 0.5  # fan_out = c_out * 1 * 1, gain=sqrt(2)
        w = std * jax.random.normal(sub, (c_out, c_in, 1, 1), dtype=jnp.float32)
        b = jnp.zeros((c_out,), dtype=jnp.float32)
        weights.append(w)
        biases.append(b)
    return weights, biases


def mlp_reference(x_nchw, weights, biases):
    """Pure-JAX f32 reference for verification."""
    N, C, H, W = x_nchw.shape
    h = jnp.transpose(x_nchw, (0, 2, 3, 1)).reshape(N * H * W, C)
    L = len(weights)
    for i in range(L):
        w = jnp.transpose(weights[i][:, :, 0, 0], (1, 0))
        h = h @ w + biases[i][None, :]
        if i < L - 1:
            h = _hard_gelu(h)
    return jnp.transpose(h.reshape(N, H, W, -1), (0, 3, 1, 2))


if __name__ == "__main__":
    in_channels, hidden_channels, num_layers, out_channels = 4, 32, 3, 8
    N, H, W = 2, 16, 16

    key = jax.random.PRNGKey(0)
    key, xk = jax.random.split(key)
    x = jax.random.normal(xk, (N, in_channels, H, W), dtype=jnp.float32)

    weights, biases = init_mlp_params(
        key, in_channels, hidden_channels, num_layers, out_channels)

    ref = mlp_reference(x, weights, biases)

    # Exact (f32-MXU) path.
    out = jax.block_until_ready(mlp_pallas(x, weights, biases))
    assert out.shape == (N, out_channels, H, W)
    assert jnp.allclose(out, ref, atol=1e-5, rtol=1e-5), "f32 mismatch vs reference"

    # bf16-MXU fast path (v6e/v7x): same kernel, bf16 operands + f32 accumulate.
    out_bf16 = jax.block_until_ready(
        mlp_pallas(x, weights, biases, mxu_dtype=jnp.bfloat16))
    assert jnp.allclose(out_bf16, ref, atol=0.25, rtol=0.05), "bf16 path diverged"

    print("KERNEL_OK")
</pallas_src>

<mosaic_0001>
module attributes {stable_mosaic.version = 11 : i64} {
  func.func @_mlp_kernel(%arg0: i32, %arg1: i32, %arg2: memref<1x4x256xf32, #tpu.memory_space<vmem>>, %arg3: memref<32x4xf32, #tpu.memory_space<vmem>>, %arg4: memref<32x1xf32, #tpu.memory_space<vmem>>, %arg5: memref<32x32xf32, #tpu.memory_space<vmem>>, %arg6: memref<32x1xf32, #tpu.memory_space<vmem>>, %arg7: memref<8x32xf32, #tpu.memory_space<vmem>>, %arg8: memref<8x1xf32, #tpu.memory_space<vmem>>, %arg9: memref<1x8x256xf32, #tpu.memory_space<vmem>>) attributes {dimension_semantics = [#tpu.dimension_semantics<parallel>, #tpu.dimension_semantics<parallel>], iteration_bounds = array<i64: 2, 1>, scalar_prefetch = 0 : i64, scratch_operands = 0 : i64, tpu.core_type = #tpu.core_type<tc>, window_params = [{transform_indices = @transform_0, window_bounds = array<i64: 1, 4, 256>}, {pipeline_mode = #tpu.pipeline_mode<synchronous>, transform_indices = @transform_1, window_bounds = array<i64: 32, 4>}, {pipeline_mode = #tpu.pipeline_mode<synchronous>, transform_indices = @transform_2, window_bounds = array<i64: 32, 1>}, {pipeline_mode = #tpu.pipeline_mode<synchronous>, transform_indices = @transform_3, window_bounds = array<i64: 32, 32>}, {pipeline_mode = #tpu.pipeline_mode<synchronous>, transform_indices = @transform_4, window_bounds = array<i64: 32, 1>}, {pipeline_mode = #tpu.pipeline_mode<synchronous>, transform_indices = @transform_5, window_bounds = array<i64: 8, 32>}, {pipeline_mode = #tpu.pipeline_mode<synchronous>, transform_indices = @transform_6, window_bounds = array<i64: 8, 1>}, {transform_indices = @transform_7, window_bounds = array<i64: 1, 8, 256>}]} {
    %c0 = arith.constant 0 : index
    %c0_0 = arith.constant 0 : index
    %c0_1 = arith.constant 0 : index
    %0 = vector.load %arg2[%c0, %c0_0, %c0_1] : memref<1x4x256xf32, #tpu.memory_space<vmem>>, vector<1x4x256xf32>
    %1 = vector.shape_cast %0 : vector<1x4x256xf32> to vector<4x256xf32>
    %c0_2 = arith.constant 0 : index
    %c0_3 = arith.constant 0 : index
    %2 = vector.load %arg3[%c0_2, %c0_3] : memref<32x4xf32, #tpu.memory_space<vmem>>, vector<32x4xf32>
    %c0_4 = arith.constant 0 : index
    %c0_5 = arith.constant 0 : index
    %3 = vector.load %arg4[%c0_4, %c0_5] : memref<32x1xf32, #tpu.memory_space<vmem>>, vector<32x1xf32>
    %cst = arith.constant dense<0.000000e+00> : vector<32x256xf32>
    %4 = tpu.matmul %2, %1, %cst {dimension_numbers = #tpu.dot_dimension_numbers<[1], [0], [0], [1], [0, 0, 1, 1], [], []>} : vector<32x4xf32>, vector<4x256xf32>, vector<32x256xf32> -> vector<32x256xf32>
    %5 = vector.broadcast %3 : vector<32x1xf32> to vector<32x256xf32>
    %6 = arith.addf %4, %5 : vector<32x256xf32>
    %cst_6 = arith.constant -1.500000e+00 : f32
    %7 = vector.broadcast %cst_6 : f32 to vector<32x256xf32>
    %8 = arith.cmpf olt, %6, %7 : vector<32x256xf32>
    %cst_7 = arith.constant 0.000000e+00 : f32
    %9 = vector.broadcast %cst_7 : f32 to vector<32x256xf32>
    %cst_8 = arith.constant 1.500000e+00 : f32
    %10 = vector.broadcast %cst_8 : f32 to vector<32x256xf32>
    %11 = arith.cmpf ogt, %6, %10 : vector<32x256xf32>
    %cst_9 = arith.constant 3.000000e+00 : f32
    %12 = vector.broadcast %cst_9 : f32 to vector<32x256xf32>
    %13 = arith.divf %6, %12 : vector<32x256xf32>
    %cst_10 = arith.constant 1.500000e+00 : f32
    %14 = vector.broadcast %cst_10 : f32 to vector<32x256xf32>
    %15 = arith.addf %6, %14 : vector<32x256xf32>
    %16 = arith.mulf %13, %15 : vector<32x256xf32>
    %17 = arith.select %11, %6, %16 : vector<32x256xi1>, vector<32x256xf32>
    %18 = arith.select %8, %9, %17 : vector<32x256xi1>, vector<32x256xf32>
    %c0_11 = arith.constant 0 : index
    %c0_12 = arith.constant 0 : index
    %19 = vector.load %arg5[%c0_11, %c0_12] : memref<32x32xf32, #tpu.memory_space<vmem>>, vector<32x32xf32>
    %c0_13 = arith.constant 0 : index
    %c0_14 = arith.constant 0 : index
    %20 = vector.load %arg6[%c0_13, %c0_14] : memref<32x1xf32, #tpu.memory_space<vmem>>, vector<32x1xf32>
    %cst_15 = arith.constant dense<0.000000e+00> : vector<32x256xf32>
    %21 = tpu.matmul %19, %18, %cst_15 {dimension_numbers = #tpu.dot_dimension_numbers<[1], [0], [0], [1], [0, 0, 1, 1], [], []>} : vector<32x32xf32>, vector<32x256xf32>, vector<32x256xf32> -> vector<32x256xf32>
    %22 = vector.broadcast %20 : vector<32x1xf32> to vector<32x256xf32>
    %23 = arith.addf %21, %22 : vector<32x256xf32>
    %cst_16 = arith.constant -1.500000e+00 : f32
    %24 = vector.broadcast %cst_16 : f32 to vector<32x256xf32>
    %25 = arith.cmpf olt, %23, %24 : vector<32x256xf32>
    %cst_17 = arith.constant 0.000000e+00 : f32
    %26 = vector.broadcast %cst_17 : f32 to vector<32x256xf32>
    %cst_18 = arith.constant 1.500000e+00 : f32
    %27 = vector.broadcast %cst_18 : f32 to vector<32x256xf32>
    %28 = arith.cmpf ogt, %23, %27 : vector<32x256xf32>
    %cst_19 = arith.constant 3.000000e+00 : f32
    %29 = vector.broadcast %cst_19 : f32 to vector<32x256xf32>
    %30 = arith.divf %23, %29 : vector<32x256xf32>
    %cst_20 = arith.constant 1.500000e+00 : f32
    %31 = vector.broadcast %cst_20 : f32 to vector<32x256xf32>
    %32 = arith.addf %23, %31 : vector<32x256xf32>
    %33 = arith.mulf %30, %32 : vector<32x256xf32>
    %34 = arith.select %28, %23, %33 : vector<32x256xi1>, vector<32x256xf32>
    %35 = arith.select %25, %26, %34 : vector<32x256xi1>, vector<32x256xf32>
    %c0_21 = arith.constant 0 : index
    %c0_22 = arith.constant 0 : index
    %36 = vector.load %arg7[%c0_21, %c0_22] : memref<8x32xf32, #tpu.memory_space<vmem>>, vector<8x32xf32>
    %c0_23 = arith.constant 0 : index
    %c0_24 = arith.constant 0 : index
    %37 = vector.load %arg8[%c0_23, %c0_24] : memref<8x1xf32, #tpu.memory_space<vmem>>, vector<8x1xf32>
    %cst_25 = arith.constant dense<0.000000e+00> : vector<8x256xf32>
    %38 = tpu.matmul %36, %35, %cst_25 {dimension_numbers = #tpu.dot_dimension_numbers<[1], [0], [0], [1], [0, 0, 1, 1], [], []>} : vector<8x32xf32>, vector<32x256xf32>, vector<8x256xf32> -> vector<8x256xf32>
    %39 = vector.broadcast %37 : vector<8x1xf32> to vector<8x256xf32>
    %40 = arith.addf %38, %39 : vector<8x256xf32>
    %c0_26 = arith.constant 0 : index
    %c0_27 = arith.constant 0 : index
    %c0_28 = arith.constant 0 : index
    %41 = vector.load %arg9[%c0_26, %c0_27, %c0_28] : memref<1x8x256xf32, #tpu.memory_space<vmem>>, vector<1x8x256xf32>
    %42 = vector.shape_cast %41 : vector<1x8x256xf32> to vector<8x256xf32>
    %43 = vector.shape_cast %40 : vector<8x256xf32> to vector<1x8x256xf32>
    tpu.vector_store %arg9[%c0_26, %c0_27, %c0_28], %43 {strides = array<i32>} : memref<1x8x256xf32, #tpu.memory_space<vmem>>, vector<1x8x256xf32>,
    return
  }
  func.func @transform_0(%arg0: i32, %arg1: i32) -> (i32, i32, i32) {
    %c0_i32 = arith.constant 0 : i32
    %c0_i32_0 = arith.constant 0 : i32
    return %arg0, %c0_i32, %arg1 : i32, i32, i32
  }
  func.func @transform_1(%arg0: i32, %arg1: i32) -> (i32, i32) {
    %c0_i32 = arith.constant 0 : i32
    %c0_i32_0 = arith.constant 0 : i32
    %c0_i32_1 = arith.constant 0 : i32
    return %c0_i32, %c0_i32_0 : i32, i32
  }
  func.func @transform_2(%arg0: i32, %arg1: i32) -> (i32, i32) {
    %c0_i32 = arith.constant 0 : i32
    %c0_i32_0 = arith.constant 0 : i32
    %c0_i32_1 = arith.constant 0 : i32
    return %c0_i32, %c0_i32_0 : i32, i32
  }
  func.func @transform_3(%arg0: i32, %arg1: i32) -> (i32, i32) {
    %c0_i32 = arith.constant 0 : i32
    %c0_i32_0 = arith.constant 0 : i32
    %c0_i32_1 = arith.constant 0 : i32
    return %c0_i32, %c0_i32_0 : i32, i32
  }
  func.func @transform_4(%arg0: i32, %arg1: i32) -> (i32, i32) {
    %c0_i32 = arith.constant 0 : i32
    %c0_i32_0 = arith.constant 0 : i32
    %c0_i32_1 = arith.constant 0 : i32
    return %c0_i32, %c0_i32_0 : i32, i32
  }
  func.func @transform_5(%arg0: i32, %arg1: i32) -> (i32, i32) {
    %c0_i32 = arith.constant 0 : i32
    %c0_i32_0 = arith.constant 0 : i32
    %c0_i32_1 = arith.constant 0 : i32
    return %c0_i32, %c0_i32_0 : i32, i32
  }
  func.func @transform_6(%arg0: i32, %arg1: i32) -> (i32, i32) {
    %c0_i32 = arith.constant 0 : i32
    %c0_i32_0 = arith.constant 0 : i32
    %c0_i32_1 = arith.constant 0 : i32
    return %c0_i32, %c0_i32_0 : i32, i32
  }
  func.func @transform_7(%arg0: i32, %arg1: i32) -> (i32, i32, i32) {
    %c0_i32 = arith.constant 0 : i32
    %c0_i32_0 = arith.constant 0 : i32
    return %arg0, %c0_i32, %arg1 : i32, i32, i32
  }
}

</mosaic_0001>

<bundles_post_ra>
// kernel: tpu_custom_call.1
= control target key start
LH: loop header
LB: loop body
LE: loop exit
PB: predicated region body
PF: predicated region fallthrough
CT: control target
= control target key end

     0   :  { %12 = vsyncpa [#allocation3], 0  ;;  %s1309_s0 = inlined_call_operand.vmem [shape: f32[2,4,256], index: 0, kind: input, shape index: {}]   ;;  %s1310_s1 = inlined_call_operand.vmem [shape: f32[32,4], index: 1, kind: input, shape index: {}]   ;;  %s1311_s2 = inlined_call_operand.vmem [shape: f32[32,1], index: 2, kind: input, shape index: {}]   ;;  %s1312_s3 = inlined_call_operand.vmem [shape: f32[32,32], index: 3, kind: input, shape index: {}]   ;;  %s1313_s4 = inlined_call_operand.vmem [shape: f32[32,1], index: 4, kind: input, shape index: {}]   ;;  %s1314_s5 = inlined_call_operand.vmem [shape: f32[8,32], index: 5, kind: input, shape index: {}]   ;;  %s1315_s6 = inlined_call_operand.vmem [shape: f32[8,1], index: 6, kind: input, shape index: {}]   ;;  %s1316_s7 = inlined_call_operand.hbm [shape: f32[2,8,256], index: 7, kind: output, shape index: {}]  }
   0x1   :  { %14 = vsyncpa [#allocation3 + $0x1], 0  ;;  %s1104_s24 = smov 0   ;;  %s1106_s25 = smov 0  }
   0x2   :  { %s1108_s26 = smov 0   ;;  %s1110_s27 = smov 0  }
   0x3   :  { %s1112_s28 = smov 0   ;;  %s1114_s29 = smov 0  }
   0x4 LB: > { %s865_s30 = sadd.s32 4294967295, %s1059_s29   ;;  %s866_s8 = sadd.s32 4294967294, %s1059_s29   ;;  %s1059_s29 = sphi %s1114_s29, %s20_s29   ;;  %s1055_s28 = sphi %s1112_s28, %s1323_s28   ;;  %s1051_s27 = sphi %s1110_s27, %s1322_s27   ;;  %s1047_s26 = sphi %s1108_s26, %s1321_s26   ;;  %s1043_s25 = sphi %s1106_s25, %s1320_s25   ;;  %s1039_s24 = sphi %s1104_s24, %s1319_s24  }
   0x5   : > { %s32_s9 = sadd.s32 1, %s1055_s28  ;;  %s195_s10 = sadd.s32 1, %s1047_s26 }
   0x6   : > { %p34_p0 = scmp.ge.s32.totalorder %s32_s9, 2  ;;  %p205_p1 = scmp.ne.s32.totalorder %s1047_s26, %s1043_s25 }
   0x7   : > { %p206_p2 = scmp.eq.s32.totalorder %s865_s30, 1  ;;  %p211_p3 = scmp.ne.s32.totalorder %s1043_s25, %s1039_s24 }
   0x8   : > { %s1325_s9 = smov (%p34_p0, %s32_s9), 0  ;;  %p212_p5 = scmp.eq.s32.totalorder %s866_s8, 1 }
   0x9   : > { %p1144_p4 = por %p206_p2, %p205_p1  ;;  %s190_s12 = ssub.s32 %s1055_s28, %s1325_s9 }
   0xa   : > { %p869_p6 = scmp.ge.s32.totalorder %s1059_s29, 1  ;;  %p193_p7 = scmp.eq.s32.totalorder %s190_s12, 0 }
   0xb   : > { %p1151_p8 = por %p212_p5, %p211_p3  ;;  %p261_p9 = scmp.lt.s32.totalorder %s1059_s29, 3 }
   0xc   : > { %s1157_s14 = scalar_select %p193_p7, %s1047_s26, %s195_s10  }
   0xd   : > { %p262_p10 = pnand %p869_p6, %p261_p9 }
   0xe   : > { %p298_p11 = scmp.lt.s32.totalorder (!%p262_p10), %s1051_s27, 1  ;;  %s922_s19 = sshll.u32 (!%p262_p10), %s1051_s27, 8 }
   0xf   : > { %265 = sbr.rel (%p262_p10) target bundleno = 684 (0x2ac), region = 48  ;;  %s787_s30 = scalar_lea.hbm (!%p262_p10), %s1316_s7, %s922_s19 }
  0x14   : > { %v1061_v0 = vmov 0.0   ;;  %v316_v1 = vld [vmem:[%s1311_s2 + $0x18] sm:$0xff]  ;;  %s299_s17 = scalar_select %p298_p11, %s1051_s27, 1  ;;  %v1062_v2 = vmov 0   ;;  %v314_v3 = vld [vmem:[%s1311_s2 + $0x8] sm:$0xff]  ;;  %v315_v4 = vld [vmem:[%s1311_s2 + $0x10] sm:$0xff] }
  0x15   : > { %421 = vmatprep.mubr.f32.mxu0 %v1061_v0  ;;  %608 = vmatprep.mubr.f32.mxu1 %v1061_v0  ;;  %v313_v5 = vld [vmem:[%s1311_s2] sm:$0xff]  ;;  %vm352_vm0 = vcmask 1043456   ;;  %vm339_vm1 = vcmask 31744   ;;  %v510_v9 = vld [vmem:[%s1313_s4 + $0x18] sm:$0xff]  ;;  %v509_v10 = vld [vmem:[%s1313_s4 + $0x10] sm:$0xff] }
  0x16   : > { %981 = vset.pattern.permute.xlu1 %v1062_v2  ;;  %980 = vset.pattern.permute.xlu0 %v1062_v2  ;;  %s921_s20 = sshll.u32 %s299_s17, 3  ;;  %v309_v8 = vld [vmem:[%s1310_s1] sm:$0xff]  ;;  %v310_v11 = vld [vmem:[%s1310_s1 + $0x8] sm:$0xff]  ;;  %v311_v14 = vld [vmem:[%s1310_s1 + $0x10] sm:$0xff]  ;;  %s294_s17 = sand.u32 1, %s1043_s25  }
  0x17   : > { %334 = vperm.xlu0 %980, %v316_v1   ;;  %324 = vperm.xlu1 %981, %v314_v3   ;;  %s305_s12 = scalar_lea.vmem %s1309_s0, %s921_s20  ;;  %v508_v12 = vld [vmem:[%s1313_s4 + $0x8] sm:$0xff]  ;;  %v507_v13 = vld [vmem:[%s1313_s4] sm:$0xff]  ;;  %v312_v16 = vld [vmem:[%s1310_s1 + $0x18] sm:$0xff]  ;;  %s870_s18 = sshll.u32 %s294_s17, 4 }
  0x18   : > { %v308_v6 = vld [vmem:[%s305_s12] sm:$0xff]  ;;  %s296_s21 = scalar_lea.vmem [#allocation2], %s870_s18  ;;  %s773_s8 = scalar_lea.sflag [#allocation3], %s294_s17 }
  0x19   : > { %v338_v7 = vcombine.high %v308_v6, %v308_v6  ;;  %v690_v15 = vld [vmem:[%s1315_s6] sm:$0xff]  ;;  %s789_s20 = sshll.u32 %s296_s21, 4  ;;  %s1063_s12 = smov [#allocation2]   ;;  %s790_s20 = int_to_ptr.vmem [resolvable:$true] %s789_s20 }
  0x1a   : > { %s983_s10 = scalar_lea.vmem %s790_s20, 256  ;;  %s987_s27 = sshll.u32 %s1063_s12, 4  ;;  %s988_s27 = int_to_ptr.vmem [resolvable:$false] %s987_s27 }
  0x1b   : > { %329 = vperm.xlu0 %980, %v315_v4   ;;  %319 = vperm.xlu1 %981, %v313_v5   ;;  %v503_v5 = vld [vmem:[%s1312_s3] sm:$0xff]  ;;  %p984_p12 = scmp.ne.s32.totalorder %s790_s20, %s983_s10  ;;  %s989_s15 = scalar_lea.vmem %s988_s27, 512 }
  0x1c   : > { %873 = vmatprep.subr.msk.mxu0 %vm352_vm0, %v338_v7  ;;  %v504_v7 = vld [vmem:[%s1312_s3 + $0x8] sm:$0xff]  ;;  %p990_p1 = scmp.lt.s32.totalorder %s790_s20, %s988_s27  ;;  %p991_p2 = scmp.lt.s32.totalorder %s989_s15, %s983_s10 }
  0x1d   : > { %874 = vmatpush1.msk.msra.mxu0 %vm352_vm0, %v308_v6  ;;  %p985_p13 = pnand %p984_p12, %p1144_p4 }
  0x1e   : > { %875 = vmatmul.mubr.msk.f32.vlgmr.msra.gmra.mxu0 %vm339_vm1, %v309_v8  ;;  %v505_v8 = vld [vmem:[%s1312_s3 + $0x10] sm:$0xff]  ;;  %p992_p3 = por %p991_p2, %p990_p1 }
  0x1f   : > { %528 = vperm.xlu0 %980, %v510_v9   ;;  %427 = vmatprep.mubr.f32.mxu0 %v1061_v0  ;;  %v506_v9 = vld [vmem:[%s1312_s3 + $0x18] sm:$0xff]  ;;  %p986_p0 = pneg %p985_p13 }
  0x20   : > { %523 = vperm.xlu1 %981, %v509_v10  }
  0x21   : > { %p993_p5 = pnand %p992_p3, %p986_p0 }
  0x22   : > { %876 = vmatmul.mubr.msk.f32.gmra.mxu0 %vm339_vm1, %v310_v11 }
  0x23   : > { %518 = vperm.xlu0 %980, %v508_v12   ;;  %433 = vmatprep.mubr.f32.mxu0 %v1061_v0 }
  0x24   : > { %513 = vperm.xlu1 %981, %v507_v13  }
  0x26   : > { %877 = vmatmul.mubr.msk.f32.gmra.mxu0 %vm339_vm1, %v311_v14 }
  0x27   : > { %693 = vperm.xlu0 %980, %v690_v15   ;;  %439 = vmatprep.mubr.f32.mxu0 %v1061_v0 }
  0x2a   : > { %878 = vmatmul.mubr.msk.f32.gmra.mxu0 %vm339_vm1, %v312_v16 }
  0x2b   : > { %763 = vmatprep.mubr.f32.mxu0 %v1061_v0 }
  0x92   : > { %v325_v18 = vpop.permute.xlu1 %324  ;;  %v335_v20 = vpop.permute.xlu0 %334 }
  0x96   : > { %v320_v23 = vpop.permute.xlu1 %319  ;;  %v330_v25 = vpop.permute.xlu0 %329 }
  0x9a   : > { %v529_v14 = vpop.permute.xlu0 %528 }
  0x9b   : > { %v524_v12 = vpop.permute.xlu1 %523 }
  0xde   : > { %v423_v17 = vpop.f32.mrf.mxu0 }
  0xdf   : > { %v1213_v26 = vadd.f32 %v423_v17, %v320_v23  ;;  %v514_v17 = vpop.permute.xlu1 %513 }
  0xe0   : > { %v425_v19 = vpop.f32.mrf.mxu0 }
  0xe1   : > { %v1215_v29 = vadd.f32 %v425_v19, %v320_v23  ;;  %v463_v36 = vmul.f32 0.33333334, %v1213_v26  ;;  %v471_v56 = vadd.f32 1.5, %v1213_v26 }
  0xe2   : > { %v429_v21 = vpop.f32.mrf.mxu0 }
  0xe3   : > { %v430_v34 = vadd.f32 %v429_v21, %v325_v18  ;;  %v464_v44 = vmul.f32 0.33333334, %v1215_v29  ;;  %v472_v54 = vadd.f32 1.5, %v1215_v29  ;;  %vm447_vm1 = vcmp.lt.f32.partialorder %v1215_v29, -1.5  ;;  %v519_v21 = vpop.permute.xlu0 %518 }
  0xe4   : > { %v431_v22 = vpop.f32.mrf.mxu0  ;;  %v479_v1 = vmul.f32 %v471_v56, %v463_v36 }
  0xe5   : > { %v432_v32 = vadd.f32 %v431_v22, %v325_v18  ;;  %v465_v50 = vmul.f32 0.33333334, %v430_v34  ;;  %v473_v51 = vadd.f32 1.5, %v430_v34  ;;  %vm448_vm14 = vcmp.lt.f32.partialorder %v430_v34, -1.5 }
  0xe6   : > { %v435_v24 = vpop.f32.mrf.mxu0  ;;  %v480_v62 = vmul.f32 %v472_v54, %v464_v44 }
  0xe7   : > { %v436_v30 = vadd.f32 %v435_v24, %v330_v25  ;;  %v466_v47 = vmul.f32 0.33333334, %v432_v32  ;;  %v474_v48 = vadd.f32 1.5, %v432_v32  ;;  %vm449_vm11 = vcmp.lt.f32.partialorder %v432_v32, -1.5 }
  0xe8   : > { %v437_v27 = vpop.f32.mrf.mxu0  ;;  %v481_v60 = vmul.f32 %v473_v51, %v465_v50  ;;  %vm457_vm0 = vcmp.gt.f32.partialorder %v432_v32, 1.5 }
  0xe9   : > { %v438_v28 = vadd.f32 %v437_v27, %v330_v25  ;;  %v467_v42 = vmul.f32 0.33333334, %v436_v30  ;;  %v475_v43 = vadd.f32 1.5, %v436_v30  ;;  %vm450_vm8 = vcmp.lt.f32.partialorder %v436_v30, -1.5 }
  0xea   : > { %v441_v31 = vpop.f32.mrf.mxu0  ;;  %v482_v58 = vmul.f32 %v474_v48, %v466_v47  ;;  %vm458_vm13 = vcmp.gt.f32.partialorder %v436_v30, 1.5  ;;  %vm885_vm15 = vmneg %vm450_vm8  ;;  %vm454_vm8 = vcmp.gt.f32.partialorder %v1213_v26, 1.5 }
  0xeb   : > { %v442_v33 = vadd.f32 %v441_v31, %v335_v20  ;;  %v468_v39 = vmul.f32 0.33333334, %v438_v28  ;;  %v476_v40 = vadd.f32 1.5, %v438_v28  ;;  %vm451_vm5 = vcmp.lt.f32.partialorder %v438_v28, -1.5 }
  0xec   : > { %v443_v35 = vpop.f32.mrf.mxu0  ;;  %v483_v55 = vmul.f32 %v475_v43, %v467_v42  ;;  %vm459_vm10 = vcmp.gt.f32.partialorder %v438_v28, 1.5  ;;  %vm883_vm12 = vmneg %vm451_vm5  ;;  %v490_v2 = vsel %vm457_vm0, %v432_v32, %v482_v58  ;;  %v487_v6 = vsel %vm454_vm8, %v1213_v26, %v479_v1 }
  0xed   : > { %v444_v37 = vadd.f32 %v443_v35, %v335_v20  ;;  %v469_v38 = vmul.f32 0.33333334, %v442_v33  ;;  %v477_v41 = vadd.f32 1.5, %v442_v33  ;;  %vm452_vm3 = vcmp.lt.f32.partialorder %v442_v33, -1.5  ;;  %vm889_vm5 = vmneg %vm448_vm14 }
  0xee   : > { %v484_v53 = vmul.f32 %v476_v40, %v468_v39  ;;  %vm460_vm7 = vcmp.gt.f32.partialorder %v442_v33, 1.5  ;;  %vm881_vm9 = vmneg %vm452_vm3  ;;  %v491_v63 = vsel %vm458_vm13, %v436_v30, %v483_v55  ;;  %vm456_vm3 = vcmp.gt.f32.partialorder %v430_v34, 1.5 }
  0xef   : > { %v470_v45 = vmul.f32 0.33333334, %v444_v37  ;;  %v478_v46 = vadd.f32 1.5, %v444_v37  ;;  %vm453_vm2 = vcmp.lt.f32.partialorder %v444_v37, -1.5  ;;  %v485_v49 = vmul.f32 %v477_v41, %v469_v38 }
  0xf0   : > { %vm461_vm4 = vcmp.gt.f32.partialorder %v444_v37, 1.5  ;;  %vm879_vm6 = vmneg %vm453_vm2  ;;  %v492_v61 = vsel %vm459_vm10, %v438_v28, %v484_v53  ;;  %v489_v3 = vsel %vm456_vm3, %v430_v34, %v481_v60  ;;  %v689_v60 = vld [vmem:[%s1314_s5] sm:$0xff] }
  0xf1   : > { %v486_v52 = vmul.f32 %v478_v46, %v470_v45  ;;  %v493_v59 = vsel %vm460_vm7, %v442_v33, %v485_v49  ;;  %vm887_vm2 = vmneg %vm449_vm11 }
  0xf2   : > { %vm891_vm7 = vmneg %vm447_vm1 }
  0xf3   : > { %v494_v57 = vsel %vm461_vm4, %v444_v37, %v486_v52  ;;  %vm446_vm4 = vcmp.lt.f32.partialorder %v1213_v26, -1.5 }
  0xf4   : > { %880 = vmatprep.subr.msk.mxu1 %vm879_vm6, %v494_v57  ;;  %vm455_vm6 = vcmp.gt.f32.partialorder %v1215_v29, 1.5  ;;  %vm893_vm10 = vmneg %vm446_vm4 }
  0xf5   : > { %882 = vmatpush1.msk.msra.mxu1 %vm881_vm9, %v493_v59  ;;  %v488_v4 = vsel %vm455_vm6, %v1215_v29, %v480_v62  ;;  %vm531_vm9 = vcmask 261120   ;;  %v694_v62 = vpop.permute.xlu0 %693 }
  0xf6   : > { %884 = vmatprep.subr.msk.mxu1 %vm883_vm12, %v492_v61 }
  0xf7   : > { %886 = vmatpush1.msk.msra.mxu1 %vm885_vm15, %v491_v63 }
  0xf8   : > { %888 = vmatprep.subr.msk.mxu1 %vm887_vm2, %v490_v2 }
  0xf9   : > { %890 = vmatpush1.msk.msra.mxu1 %vm889_vm5, %v489_v3 }
  0xfa   : > { %892 = vmatprep.subr.msk.mxu1 %vm891_vm7, %v488_v4 }
  0xfb   : > { %894 = vmatpush1.msk.msra.mxu1 %vm893_vm10, %v487_v6 }
  0xfc   : > { %895 = vmatmul.mubr.msk.f32.vlgmr.msra.gmra.mxu1 %vm531_vm9, %v503_v5 }
  0xfd   : > { %614 = vmatprep.mubr.f32.mxu1 %v1061_v0 }
 0x100   : > { %896 = vmatmul.mubr.msk.f32.gmra.mxu1 %vm531_vm9, %v504_v7 }
 0x101   : > { %620 = vmatprep.mubr.f32.mxu1 %v1061_v0 }
 0x104   : > { %897 = vmatmul.mubr.msk.f32.gmra.mxu1 %vm531_vm9, %v505_v8 }
 0x105   : > { %626 = vmatprep.mubr.f32.mxu1 %v1061_v0 }
 0x108   : > { %898 = vmatmul.mubr.msk.f32.gmra.mxu1 %vm531_vm9, %v506_v9 }
 0x1bc   : > { %v610_v10 = vpop.f32.mrf.mxu1 }
 0x1bd   : > { %v1249_v18 = vadd.f32 %v610_v10, %v514_v17 }
 0x1be   : > { %v612_v11 = vpop.f32.mrf.mxu1 }
 0x1bf   : > { %v1251_v0 = vadd.f32 %v612_v11, %v514_v17  ;;  %v649_v28 = vmul.f32 0.33333334, %v1249_v18  ;;  %v657_v48 = vadd.f32 1.5, %v1249_v18 }
 0x1c0   : > { %v616_v13 = vpop.f32.mrf.mxu1 }
 0x1c1   : > { %v617_v26 = vadd.f32 %v616_v13, %v519_v21  ;;  %v650_v36 = vmul.f32 0.33333334, %v1251_v0  ;;  %v658_v46 = vadd.f32 1.5, %v1251_v0  ;;  %v665_v56 = vmul.f32 %v657_v48, %v649_v28 }
 0x1c2   : > { %v618_v15 = vpop.f32.mrf.mxu1 }
 0x1c3   : > { %v619_v24 = vadd.f32 %v618_v15, %v519_v21  ;;  %v651_v42 = vmul.f32 0.33333334, %v617_v26  ;;  %v659_v43 = vadd.f32 1.5, %v617_v26  ;;  %vm635_vm7 = vcmp.lt.f32.partialorder %v617_v26, -1.5 }
 0x1c4   : > { %v622_v16 = vpop.f32.mrf.mxu1  ;;  %v666_v54 = vmul.f32 %v658_v46, %v650_v36 }
 0x1c5   : > { %v623_v22 = vadd.f32 %v622_v16, %v524_v12  ;;  %v652_v39 = vmul.f32 0.33333334, %v619_v24  ;;  %v660_v40 = vadd.f32 1.5, %v619_v24  ;;  %vm636_vm4 = vcmp.lt.f32.partialorder %v619_v24, -1.5 }
 0x1c6   : > { %v624_v19 = vpop.f32.mrf.mxu1  ;;  %v667_v52 = vmul.f32 %v659_v43, %v651_v42  ;;  %vm644_vm10 = vcmp.gt.f32.partialorder %v619_v24, 1.5 }
 0x1c7   : > { %v625_v20 = vadd.f32 %v624_v19, %v524_v12  ;;  %v653_v34 = vmul.f32 0.33333334, %v623_v22  ;;  %v661_v35 = vadd.f32 1.5, %v623_v22  ;;  %vm637_vm1 = vcmp.lt.f32.partialorder %v623_v22, -1.5 }
 0x1c8   : > { %v628_v23 = vpop.f32.mrf.mxu1  ;;  %v668_v50 = vmul.f32 %v660_v40, %v652_v39  ;;  %vm645_vm6 = vcmp.gt.f32.partialorder %v623_v22, 1.5  ;;  %vm905_vm8 = vmneg %vm637_vm1 }
 0x1c9   : > { %v629_v25 = vadd.f32 %v628_v23, %v529_v14  ;;  %v654_v31 = vmul.f32 0.33333334, %v625_v20  ;;  %v662_v32 = vadd.f32 1.5, %v625_v20  ;;  %vm638_vm14 = vcmp.lt.f32.partialorder %v625_v20, -1.5 }
 0x1ca   : > { %v630_v27 = vpop.f32.mrf.mxu1  ;;  %v669_v47 = vmul.f32 %v661_v35, %v653_v34  ;;  %vm646_vm3 = vcmp.gt.f32.partialorder %v625_v20, 1.5  ;;  %vm903_vm5 = vmneg %vm638_vm14  ;;  %v676_v57 = vsel %vm644_vm10, %v619_v24, %v668_v50 }
 0x1cb   : > { %v631_v29 = vadd.f32 %v630_v27, %v529_v14  ;;  %v655_v30 = vmul.f32 0.33333334, %v629_v25  ;;  %v663_v33 = vadd.f32 1.5, %v629_v25  ;;  %vm639_vm12 = vcmp.lt.f32.partialorder %v629_v25, -1.5  ;;  %vm909_vm14 = vmneg %vm635_vm7 }
 0x1cc   : > { %v670_v45 = vmul.f32 %v662_v32, %v654_v31  ;;  %vm647_vm0 = vcmp.gt.f32.partialorder %v629_v25, 1.5  ;;  %vm901_vm2 = vmneg %vm639_vm12  ;;  %v677_v55 = vsel %vm645_vm6, %v623_v22, %v669_v47 }
 0x1cd   : > { %v656_v37 = vmul.f32 0.33333334, %v631_v29  ;;  %v664_v38 = vadd.f32 1.5, %v631_v29  ;;  %vm640_vm11 = vcmp.lt.f32.partialorder %v631_v29, -1.5  ;;  %v671_v41 = vmul.f32 %v663_v33, %v655_v30  ;;  %vm907_vm12 = vmneg %vm636_vm4 }
 0x1ce   : > { %vm648_vm13 = vcmp.gt.f32.partialorder %v631_v29, 1.5  ;;  %vm899_vm15 = vmneg %vm640_vm11  ;;  %v678_v53 = vsel %vm646_vm3, %v625_v20, %v670_v45  ;;  %vm634_vm11 = vcmp.lt.f32.partialorder %v1251_v0, -1.5 }
 0x1cf   : > { %v672_v44 = vmul.f32 %v664_v38, %v656_v37  ;;  %v679_v51 = vsel %vm647_vm0, %v629_v25, %v671_v41  ;;  %vm642_vm0 = vcmp.gt.f32.partialorder %v1251_v0, 1.5  ;;  %vm911_vm1 = vmneg %vm634_vm11 }
 0x1d0   : > { %v674_v59 = vsel %vm642_vm0, %v1251_v0, %v666_v54 }
 0x1d1   : > { %v680_v49 = vsel %vm648_vm13, %v631_v29, %v672_v44  ;;  %vm643_vm13 = vcmp.gt.f32.partialorder %v617_v26, 1.5 }
 0x1d2   : > { %900 = vmatprep.subr.msk.mxu0 %vm899_vm15, %v680_v49  ;;  %vm633_vm15 = vcmp.lt.f32.partialorder %v1249_v18, -1.5  ;;  %v675_v58 = vsel %vm643_vm13, %v617_v26, %v667_v52 }
 0x1d3   : > { %902 = vmatpush1.msk.msra.mxu0 %vm901_vm2, %v679_v51  ;;  %vm641_vm2 = vcmp.gt.f32.partialorder %v1249_v18, 1.5  ;;  %vm913_vm3 = vmneg %vm633_vm15 }
 0x1d4   : > { %904 = vmatprep.subr.msk.mxu0 %vm903_vm5, %v678_v53  ;;  %v673_v61 = vsel %vm641_vm2, %v1249_v18, %v665_v56 }
 0x1d5   : > { %906 = vmatpush1.msk.msra.mxu0 %vm905_vm8, %v677_v55 }
 0x1d6   : > { %908 = vmatprep.subr.msk.mxu0 %vm907_vm12, %v676_v57 }
 0x1d7   : > { %910 = vmatpush1.msk.msra.mxu0 %vm909_vm14, %v675_v58 }
 0x1d8   : > { %912 = vmatprep.subr.msk.mxu0 %vm911_vm1, %v674_v59 }
 0x1d9   : > { %914 = vmatpush1.msk.msra.mxu0 %vm913_vm3, %v673_v61 }
 0x1da   : > { %915 = vmatmul.mubr.msk.f32.vlgmr.msra.gmra.mxu0 %vm531_vm9, %v689_v60 }
 0x29a   : > { %v765_v63 = vpop.f32.mrf.mxu0 }
 0x29b   : > { %v766_v1 = vadd.f32 %v765_v63, %v694_v62 }
 0x29c   : > { %v767_v2 = vpop.f32.mrf.mxu0 }
 0x29d   : > { %770 = vst [vmem:[%s296_s21] sm:$0xff] %v766_v1  ;;  %v768_v3 = vadd.f32 %v767_v2, %v694_v62 }
 0x29f   : > { %771 = vst [vmem:[%s296_s21 + $0x8] sm:$0xff] %v768_v3 }
 0x2a0   : > { %996 = shalt.err (!%p993_p5)
}
 0x2a1   : > { %s997_s16 = scalar_lea.hbm %s787_s30, 256  ;;  %s1001_s19 = scalar_lea.hbm %s1316_s7, 512 }
 0x2a2   : > { %p998_p6 = scmp.ne.s32.totalorder %s787_s30, %s997_s16  ;;  %p1002_p10 = scmp.lt.s32.totalorder %s787_s30, %s1316_s7 }
 0x2a3   : > { %p1003_p11 = scmp.lt.s32.totalorder %s1001_s19, %s997_s16 }
 0x2a4   : > { %p999_p7 = pnand %p998_p6, %p1144_p4 }
 0x2a5   : > { %p1004_p12 = por %p1003_p11, %p1002_p10 }
 0x2a6   : > { %p1000_p9 = pneg %p999_p7 }
 0x2a8   : > { %p1005_p13 = pnand %p1004_p12, %p1000_p9 }
 0x2aa   : > { %1008 = shalt.err (!%p1005_p13)
}
 0x2ab   : > { %923 = dma.vmem_to_hbm [thread:$0]  (%p1144_p4), %s790_s20, 256, %s787_s30, %s773_s8  }
 0x2ac PF: > { %p929_p0 = scmp.ge.s32.totalorder %s1059_s29, 2  ;;  %s801_s23 = sand.u32 1, %s1039_s24  }
 0x2ad   : > { %s802_s10 = scalar_lea.sflag [#allocation3], %s801_s23 }
 0x2ae   : > { %p926_p1 = pnand %p929_p0, %p1151_p8 }
 0x2b0   : > { %p927_p2 = pneg %p926_p1 }
 0x2b2   : > { %1034 = dma.done.wait (%p927_p2), %s802_s10, 256  }
 0x2b3   : > { %1036 = vsyncadd (%p927_p2), %s802_s10, 4294967040  ;;  %s20_s29 = sadd.s32 1, %s1059_s29   ;;  %s1319_s24 = smov %s1043_s25 }
 0x2b4   : > { %p17_p3 = scmp.ge.s32.totalorder %s20_s29, 4   ;;  %s1320_s25 = smov %s1047_s26 }
 0x2b5   : > { %s1321_s26 = smov %s1157_s14  ;;  %s1322_s27 = smov %s1055_s28 }
 0x2b6   : > { %s1323_s28 = smov %s1325_s9  ;;  %19 = sbr.rel (!%p17_p3) target bundleno = 4 (0x4), region = 83 }
 0x2bb   :  { %807 = vsyncpa [#allocation3], 1 }
 0x2bc   :  { %809 = vsyncpa [#allocation3 + $0x1], 1 }

</bundles_post_ra>
